<compile_context>
chip_gen: v7x
topology: tpu7x:2x2x1
jax: 0.10.0
libtpu: 0.0.40
codegen_flags: <defaults>
</compile_context>

<pallas_src>
import jax
import jax.numpy as jnp
from jax.experimental import pallas as pl
from jax.experimental.pallas import tpu as pltpu

LANES = 128
SUBLANES = 8
MAX_TILE_ROWS = 1024   # (1024, 128) f32 = 512 KiB / input / buffer -> ~2 MiB VMEM total
NUM_CORES = 2          # leading "parallel" grid axis (v7x megacore; no-op on 1-TC chips)


def _make_kernel(n_valid, tile_rows, blocks_per_core):
    sub_blocks = tile_rows // SUBLANES

    def kernel(x_ref, t_ref, bce_ref, xt_ref, xs_ref, ts_ref):
        c = pl.program_id(0)   # core-split axis ("parallel")
        i = pl.program_id(1)   # streaming axis ("arbitrary", accumulated)

        # Zero this core's resident accumulators at the start of its sweep.
        @pl.when(i == 0)
        def _():
            bce_ref[...] = jnp.zeros_like(bce_ref)
            xt_ref[...] = jnp.zeros_like(xt_ref)
            xs_ref[...] = jnp.zeros_like(xs_ref)
            ts_ref[...] = jnp.zeros_like(ts_ref)

        # Stream native dtype (f32 or bf16) from HBM, do all math in f32.
        x = x_ref[...].astype(jnp.float32)
        t = t_ref[...].astype(jnp.float32)

        # Validity mask from the *intended* (unclamped) block index: masks the
        # <=1023 pad elements, the ragged last block's out-of-bounds rows and
        # fully-out-of-range ghost blocks of the core split. jnp.where (select)
        # is safe even against garbage/NaN out-of-bounds buffer contents.
        blk = c * blocks_per_core + i
        row = jax.lax.broadcasted_iota(jnp.int32, (tile_rows, LANES), 0)
        lane = jax.lax.broadcasted_iota(jnp.int32, (tile_rows, LANES), 1)
        idx = (blk * tile_rows + row) * LANES + lane
        valid = idx < n_valid

        # BCE term: exact torch.nn.BCELoss(sigmoid(x), t) element math,
        # including PyTorch's log clamp at -100.
        # (A logits-form BCE would halve EUP work but diverges from BCELoss for
        #  saturated logits; kept exact since the kernel stays HBM-bound.)
        p = jax.nn.sigmoid(x)
        log_p = jnp.maximum(jnp.log(p), -100.0)
        log_1mp = jnp.maximum(jnp.log(1.0 - p), -100.0)
        bce = -(t * log_p + (1.0 - t) * log_1mp)

        zeros = jnp.zeros_like(x)
        xv = jnp.where(valid, x, zeros)
        tv = jnp.where(valid, t, zeros)
        bce = jnp.where(valid, bce, zeros)

        # Deferred reduction: fold the (tile_rows, 128) tile onto an (8, 128)
        # vreg accumulator with pure VPU adds; the cross-lane/sublane reduce to
        # a scalar happens once, outside the kernel.
        def fold(v):
            return jnp.sum(v.reshape(sub_blocks, SUBLANES, LANES), axis=0)

        bce_ref[...] += fold(bce)[None]
        xt_ref[...] += fold(xv * tv)[None]
        xs_ref[...] += fold(xv)[None]
        ts_ref[...] += fold(tv)[None]

    return kernel


def cd_loss(input_arr, target_arr):
    """BCELoss(sigmoid(input), target) + dice-style loss on the RAW input."""
    n = input_arr.size
    assert target_arr.size == n

    def prep(a):
        # Keep narrow float dtypes (bf16) in HBM and upcast in-kernel; everything
        # else is cast to f32 up front.
        if a.dtype != jnp.bfloat16 and a.dtype != jnp.float32:
            a = a.astype(jnp.float32)
        return a.reshape(-1)

    x = prep(input_arr)
    t = prep(target_arr)

    chunk = SUBLANES * LANES                       # 1024
    n_pad = ((n + chunk - 1) // chunk) * chunk
    pad = n_pad - n
    if pad:                                        # copy only when actually needed
        x = jnp.pad(x, (0, pad))
        t = jnp.pad(t, (0, pad))
    rows = n_pad // LANES                          # multiple of 8
    x2 = x.reshape(rows, LANES)                    # free reshape (contiguous)
    t2 = t.reshape(rows, LANES)

    tile_rows = min(MAX_TILE_ROWS, rows)           # multiple of 8, <= rows
    num_blocks = (rows + tile_rows - 1) // tile_rows
    num_cores = max(1, min(NUM_CORES, num_blocks))
    blocks_per_core = (num_blocks + num_cores - 1) // num_cores

    def in_index_map(c, i):
        b = c * blocks_per_core + i
        # Clamp ghost blocks (beyond the last real block) to a valid block; their
        # contribution is zeroed by the in-kernel mask.
        return jnp.minimum(b, num_blocks - 1), 0

    tile_spec = pl.BlockSpec((tile_rows, LANES), in_index_map)
    acc_spec = pl.BlockSpec((1, SUBLANES, LANES), lambda c, i: (c, 0, 0))
    acc_shape = jax.ShapeDtypeStruct((num_cores, SUBLANES, LANES), jnp.float32)

    bce_acc, xt_acc, xs_acc, ts_acc = pl.pallas_call(
        _make_kernel(n, tile_rows, blocks_per_core),
        out_shape=[acc_shape] * 4,
        grid_spec=pltpu.PrefetchScalarGridSpec(
            num_scalar_prefetch=0,
            grid=(num_cores, blocks_per_core),
            in_specs=[tile_spec, tile_spec],
            out_specs=[acc_spec] * 4,
        ),
        compiler_params=pltpu.CompilerParams(
            dimension_semantics=("parallel", "arbitrary"),
        ),
    )(x2, t2)

    # Tiny final reductions + scalar glue in JAX.
    bce_sum = jnp.sum(bce_acc)
    xt = jnp.sum(xt_acc)
    xs = jnp.sum(xs_acc)
    ts = jnp.sum(ts_acc)

    smooth = 1.0
    bce_loss = bce_sum / jnp.float32(n)            # BCELoss 'mean' reduction
    dic_loss = 1.0 - (2.0 * xt + smooth) / (xs + ts + smooth)
    return dic_loss + bce_loss


def _cd_loss_ref(x, t):
    x = x.astype(jnp.float32).reshape(-1)
    t = t.astype(jnp.float32).reshape(-1)
    p = jax.nn.sigmoid(x)
    bce = jnp.mean(
        -(t * jnp.maximum(jnp.log(p), -100.0)
          + (1.0 - t) * jnp.maximum(jnp.log(1.0 - p), -100.0))
    )
    smooth = 1.0
    inter = jnp.sum(x * t)
    dice = 1.0 - (2.0 * inter + smooth) / (jnp.sum(x) + jnp.sum(t) + smooth)
    return dice + bce


if __name__ == "__main__":
    key = jax.random.PRNGKey(0)

    cases = [
        ((2, 4, 16, 16), jnp.float32),    # main small NCHW case (no padding, single block)
        ((2, 3, 15, 17), jnp.float32),    # n % 128 != 0 -> pad + in-kernel mask path
        ((5, 4, 128, 128), jnp.float32),  # multi-block: ragged last block + 2-core split + ghost block
        ((2, 4, 16, 16), jnp.bfloat16),   # bf16 streaming, f32 accumulation
    ]

    for case_idx, (shape, dtype) in enumerate(cases):
        k1, k2 = jax.random.split(jax.random.fold_in(key, case_idx))
        inp = jax.random.normal(k1, shape, dtype=jnp.float32).astype(dtype)
        tgt = jax.random.uniform(k2, shape, dtype=jnp.float32).astype(dtype)  # targets in [0,1]

        out = jax.block_until_ready(cd_loss(inp, tgt))
        ref = jax.block_until_ready(_cd_loss_ref(inp, tgt))
        assert jnp.allclose(out, ref, rtol=1e-5, atol=1e-5), (shape, dtype, out, ref)

    print("KERNEL_OK")
</pallas_src>

<mosaic_0001>
module attributes {stable_mosaic.version = 11 : i64} {
  func.func @kernel(%arg0: i32, %arg1: i32, %arg2: memref<16x128xf32, #tpu.memory_space<vmem>>, %arg3: memref<16x128xf32, #tpu.memory_space<vmem>>, %arg4: memref<1x8x128xf32, #tpu.memory_space<vmem>>, %arg5: memref<1x8x128xf32, #tpu.memory_space<vmem>>, %arg6: memref<1x8x128xf32, #tpu.memory_space<vmem>>, %arg7: memref<1x8x128xf32, #tpu.memory_space<vmem>>) attributes {dimension_semantics = [#tpu.dimension_semantics<parallel>, #tpu.dimension_semantics<arbitrary>], iteration_bounds = array<i64: 1, 1>, scalar_prefetch = 0 : i64, scratch_operands = 0 : i64, tpu.core_type = #tpu.core_type<tc>, window_params = [{transform_indices = @transform_0, window_bounds = array<i64: 16, 128>}, {transform_indices = @transform_1, window_bounds = array<i64: 16, 128>}, {transform_indices = @transform_2, window_bounds = array<i64: 1, 8, 128>}, {transform_indices = @transform_3, window_bounds = array<i64: 1, 8, 128>}, {transform_indices = @transform_4, window_bounds = array<i64: 1, 8, 128>}, {transform_indices = @transform_5, window_bounds = array<i64: 1, 8, 128>}]} {
    %c0_i32 = arith.constant 0 : i32
    %0 = arith.cmpi eq, %arg1, %c0_i32 : i32
    %1 = arith.extui %0 : i1 to i32
    %c0_i32_0 = arith.constant 0 : i32
    %2 = arith.cmpi ne, %1, %c0_i32_0 : i32
    scf.if %2 {
      %cst_38 = arith.constant 0.000000e+00 : f32
      %66 = vector.broadcast %cst_38 : f32 to vector<1x8x128xf32>
      %c0_39 = arith.constant 0 : index
      %c0_40 = arith.constant 0 : index
      %c0_41 = arith.constant 0 : index
      %67 = vector.load %arg4[%c0_39, %c0_40, %c0_41] : memref<1x8x128xf32, #tpu.memory_space<vmem>>, vector<1x8x128xf32>
      tpu.vector_store %arg4[%c0_39, %c0_40, %c0_41], %66 {strides = array<i32>} : memref<1x8x128xf32, #tpu.memory_space<vmem>>, vector<1x8x128xf32>,
      %cst_42 = arith.constant 0.000000e+00 : f32
      %68 = vector.broadcast %cst_42 : f32 to vector<1x8x128xf32>
      %c0_43 = arith.constant 0 : index
      %c0_44 = arith.constant 0 : index
      %c0_45 = arith.constant 0 : index
      %69 = vector.load %arg5[%c0_43, %c0_44, %c0_45] : memref<1x8x128xf32, #tpu.memory_space<vmem>>, vector<1x8x128xf32>
      tpu.vector_store %arg5[%c0_43, %c0_44, %c0_45], %68 {strides = array<i32>} : memref<1x8x128xf32, #tpu.memory_space<vmem>>, vector<1x8x128xf32>,
      %cst_46 = arith.constant 0.000000e+00 : f32
      %70 = vector.broadcast %cst_46 : f32 to vector<1x8x128xf32>
      %c0_47 = arith.constant 0 : index
      %c0_48 = arith.constant 0 : index
      %c0_49 = arith.constant 0 : index
      %71 = vector.load %arg6[%c0_47, %c0_48, %c0_49] : memref<1x8x128xf32, #tpu.memory_space<vmem>>, vector<1x8x128xf32>
      tpu.vector_store %arg6[%c0_47, %c0_48, %c0_49], %70 {strides = array<i32>} : memref<1x8x128xf32, #tpu.memory_space<vmem>>, vector<1x8x128xf32>,
      %cst_50 = arith.constant 0.000000e+00 : f32
      %72 = vector.broadcast %cst_50 : f32 to vector<1x8x128xf32>
      %c0_51 = arith.constant 0 : index
      %c0_52 = arith.constant 0 : index
      %c0_53 = arith.constant 0 : index
      %73 = vector.load %arg7[%c0_51, %c0_52, %c0_53] : memref<1x8x128xf32, #tpu.memory_space<vmem>>, vector<1x8x128xf32>
      tpu.vector_store %arg7[%c0_51, %c0_52, %c0_53], %72 {strides = array<i32>} : memref<1x8x128xf32, #tpu.memory_space<vmem>>, vector<1x8x128xf32>,
    } else {
    }
    %c0 = arith.constant 0 : index
    %c0_1 = arith.constant 0 : index
    %3 = vector.load %arg2[%c0, %c0_1] : memref<16x128xf32, #tpu.memory_space<vmem>>, vector<16x128xf32>
    %c0_2 = arith.constant 0 : index
    %c0_3 = arith.constant 0 : index
    %4 = vector.load %arg3[%c0_2, %c0_3] : memref<16x128xf32, #tpu.memory_space<vmem>>, vector<16x128xf32>
    %c1_i32 = arith.constant 1 : i32
    %5 = arith.muli %arg0, %c1_i32 : i32
    %6 = arith.addi %5, %arg1 : i32
    %7 = tpu.iota {dimensions = array<i32: 0>} : vector<16x128xi32>
    %8 = tpu.iota {dimensions = array<i32: 1>} : vector<16x128xi32>
    %c16_i32 = arith.constant 16 : i32
    %9 = arith.muli %6, %c16_i32 : i32
    %10 = vector.broadcast %9 : i32 to vector<16x128xi32>
    %11 = arith.addi %10, %7 : vector<16x128xi32>
    %c128_i32 = arith.constant 128 : i32
    %12 = vector.broadcast %c128_i32 : i32 to vector<16x128xi32>
    %13 = arith.muli %11, %12 : vector<16x128xi32>
    %14 = arith.addi %13, %8 : vector<16x128xi32>
    %c2048_i32 = arith.constant 2048 : i32
    %15 = vector.broadcast %c2048_i32 : i32 to vector<16x128xi32>
    %16 = arith.cmpi slt, %14, %15 : vector<16x128xi32>
    %17 = arith.negf %3 : vector<16x128xf32>
    %18 = math.exp %17 : vector<16x128xf32>
    %cst = arith.constant 1.000000e+00 : f32
    %19 = vector.broadcast %cst : f32 to vector<16x128xf32>
    %20 = arith.addf %19, %18 : vector<16x128xf32>
    %21 = arith.divf %19, %20 : vector<16x128xf32>
    %22 = math.log %21 : vector<16x128xf32>
    %cst_4 = arith.constant -1.000000e+02 : f32
    %23 = vector.broadcast %cst_4 : f32 to vector<16x128xf32>
    %24 = arith.maximumf %22, %23 : vector<16x128xf32>
    %cst_5 = arith.constant 1.000000e+00 : f32
    %25 = vector.broadcast %cst_5 : f32 to vector<16x128xf32>
    %26 = arith.subf %25, %21 : vector<16x128xf32>
    %27 = math.log %26 : vector<16x128xf32>
    %cst_6 = arith.constant -1.000000e+02 : f32
    %28 = vector.broadcast %cst_6 : f32 to vector<16x128xf32>
    %29 = arith.maximumf %27, %28 : vector<16x128xf32>
    %30 = arith.mulf %4, %24 : vector<16x128xf32>
    %cst_7 = arith.constant 1.000000e+00 : f32
    %31 = vector.broadcast %cst_7 : f32 to vector<16x128xf32>
    %32 = arith.subf %31, %4 : vector<16x128xf32>
    %33 = arith.mulf %32, %29 : vector<16x128xf32>
    %34 = arith.addf %30, %33 : vector<16x128xf32>
    %cst_8 = arith.constant 0.000000e+00 : f32
    %35 = vector.broadcast %cst_8 : f32 to vector<16x128xf32>
    %36 = arith.subf %35, %34 : vector<16x128xf32>
    %cst_9 = arith.constant 0.000000e+00 : f32
    %37 = vector.broadcast %cst_9 : f32 to vector<16x128xf32>
    %38 = arith.select %16, %3, %37 : vector<16x128xi1>, vector<16x128xf32>
    %39 = arith.select %16, %4, %37 : vector<16x128xi1>, vector<16x128xf32>
    %40 = arith.select %16, %36, %37 : vector<16x128xi1>, vector<16x128xf32>
    %c0_10 = arith.constant 0 : index
    %c0_11 = arith.constant 0 : index
    %c0_12 = arith.constant 0 : index
    %41 = vector.load %arg4[%c0_10, %c0_11, %c0_12] : memref<1x8x128xf32, #tpu.memory_space<vmem>>, vector<1x8x128xf32>
    %42 = vector.shape_cast %40 : vector<16x128xf32> to vector<2x8x128xf32>
    %cst_13 = arith.constant dense<0.000000e+00> : vector<8x128xf32>
    %43 = vector.multi_reduction <add>, %42, %cst_13 [0] : vector<2x8x128xf32> to vector<8x128xf32>
    %44 = vector.shape_cast %43 : vector<8x128xf32> to vector<1x8x128xf32>
    %45 = arith.addf %41, %44 : vector<1x8x128xf32>
    %c0_14 = arith.constant 0 : index
    %c0_15 = arith.constant 0 : index
    %c0_16 = arith.constant 0 : index
    %46 = vector.load %arg4[%c0_14, %c0_15, %c0_16] : memref<1x8x128xf32, #tpu.memory_space<vmem>>, vector<1x8x128xf32>
    tpu.vector_store %arg4[%c0_14, %c0_15, %c0_16], %45 {strides = array<i32>} : memref<1x8x128xf32, #tpu.memory_space<vmem>>, vector<1x8x128xf32>,
    %c0_17 = arith.constant 0 : index
    %c0_18 = arith.constant 0 : index
    %c0_19 = arith.constant 0 : index
    %47 = vector.load %arg5[%c0_17, %c0_18, %c0_19] : memref<1x8x128xf32, #tpu.memory_space<vmem>>, vector<1x8x128xf32>
    %48 = arith.mulf %38, %39 : vector<16x128xf32>
    %49 = vector.shape_cast %48 : vector<16x128xf32> to vector<2x8x128xf32>
    %cst_20 = arith.constant dense<0.000000e+00> : vector<8x128xf32>
    %50 = vector.multi_reduction <add>, %49, %cst_20 [0] : vector<2x8x128xf32> to vector<8x128xf32>
    %51 = vector.shape_cast %50 : vector<8x128xf32> to vector<1x8x128xf32>
    %52 = arith.addf %47, %51 : vector<1x8x128xf32>
    %c0_21 = arith.constant 0 : index
    %c0_22 = arith.constant 0 : index
    %c0_23 = arith.constant 0 : index
    %53 = vector.load %arg5[%c0_21, %c0_22, %c0_23] : memref<1x8x128xf32, #tpu.memory_space<vmem>>, vector<1x8x128xf32>
    tpu.vector_store %arg5[%c0_21, %c0_22, %c0_23], %52 {strides = array<i32>} : memref<1x8x128xf32, #tpu.memory_space<vmem>>, vector<1x8x128xf32>,
    %c0_24 = arith.constant 0 : index
    %c0_25 = arith.constant 0 : index
    %c0_26 = arith.constant 0 : index
    %54 = vector.load %arg6[%c0_24, %c0_25, %c0_26] : memref<1x8x128xf32, #tpu.memory_space<vmem>>, vector<1x8x128xf32>
    %55 = vector.shape_cast %38 : vector<16x128xf32> to vector<2x8x128xf32>
    %cst_27 = arith.constant dense<0.000000e+00> : vector<8x128xf32>
    %56 = vector.multi_reduction <add>, %55, %cst_27 [0] : vector<2x8x128xf32> to vector<8x128xf32>
    %57 = vector.shape_cast %56 : vector<8x128xf32> to vector<1x8x128xf32>
    %58 = arith.addf %54, %57 : vector<1x8x128xf32>
    %c0_28 = arith.constant 0 : index
    %c0_29 = arith.constant 0 : index
    %c0_30 = arith.constant 0 : index
    %59 = vector.load %arg6[%c0_28, %c0_29, %c0_30] : memref<1x8x128xf32, #tpu.memory_space<vmem>>, vector<1x8x128xf32>
    tpu.vector_store %arg6[%c0_28, %c0_29, %c0_30], %58 {strides = array<i32>} : memref<1x8x128xf32, #tpu.memory_space<vmem>>, vector<1x8x128xf32>,
    %c0_31 = arith.constant 0 : index
    %c0_32 = arith.constant 0 : index
    %c0_33 = arith.constant 0 : index
    %60 = vector.load %arg7[%c0_31, %c0_32, %c0_33] : memref<1x8x128xf32, #tpu.memory_space<vmem>>, vector<1x8x128xf32>
    %61 = vector.shape_cast %39 : vector<16x128xf32> to vector<2x8x128xf32>
    %cst_34 = arith.constant dense<0.000000e+00> : vector<8x128xf32>
    %62 = vector.multi_reduction <add>, %61, %cst_34 [0] : vector<2x8x128xf32> to vector<8x128xf32>
    %63 = vector.shape_cast %62 : vector<8x128xf32> to vector<1x8x128xf32>
    %64 = arith.addf %60, %63 : vector<1x8x128xf32>
    %c0_35 = arith.constant 0 : index
    %c0_36 = arith.constant 0 : index
    %c0_37 = arith.constant 0 : index
    %65 = vector.load %arg7[%c0_35, %c0_36, %c0_37] : memref<1x8x128xf32, #tpu.memory_space<vmem>>, vector<1x8x128xf32>
    tpu.vector_store %arg7[%c0_35, %c0_36, %c0_37], %64 {strides = array<i32>} : memref<1x8x128xf32, #tpu.memory_space<vmem>>, vector<1x8x128xf32>,
    return
  }
  func.func @transform_0(%arg0: i32, %arg1: i32) -> (i32, i32) {
    %c1_i32 = arith.constant 1 : i32
    %0 = arith.muli %arg0, %c1_i32 : i32
    %1 = arith.addi %0, %arg1 : i32
    %c0_i32 = arith.constant 0 : i32
    %2 = arith.minsi %1, %c0_i32 : i32
    %c0_i32_0 = arith.constant 0 : i32
    %c0_i32_1 = arith.constant 0 : i32
    return %2, %c0_i32_0 : i32, i32
  }
  func.func @transform_1(%arg0: i32, %arg1: i32) -> (i32, i32) {
    %c1_i32 = arith.constant 1 : i32
    %0 = arith.muli %arg0, %c1_i32 : i32
    %1 = arith.addi %0, %arg1 : i32
    %c0_i32 = arith.constant 0 : i32
    %2 = arith.minsi %1, %c0_i32 : i32
    %c0_i32_0 = arith.constant 0 : i32
    %c0_i32_1 = arith.constant 0 : i32
    return %2, %c0_i32_0 : i32, i32
  }
  func.func @transform_2(%arg0: i32, %arg1: i32) -> (i32, i32, i32) {
    %c0_i32 = arith.constant 0 : i32
    %c0_i32_0 = arith.constant 0 : i32
    %c0_i32_1 = arith.constant 0 : i32
    return %arg0, %c0_i32, %c0_i32_0 : i32, i32, i32
  }
  func.func @transform_3(%arg0: i32, %arg1: i32) -> (i32, i32, i32) {
    %c0_i32 = arith.constant 0 : i32
    %c0_i32_0 = arith.constant 0 : i32
    %c0_i32_1 = arith.constant 0 : i32
    return %arg0, %c0_i32, %c0_i32_0 : i32, i32, i32
  }
  func.func @transform_4(%arg0: i32, %arg1: i32) -> (i32, i32, i32) {
    %c0_i32 = arith.constant 0 : i32
    %c0_i32_0 = arith.constant 0 : i32
    %c0_i32_1 = arith.constant 0 : i32
    return %arg0, %c0_i32, %c0_i32_0 : i32, i32, i32
  }
  func.func @transform_5(%arg0: i32, %arg1: i32) -> (i32, i32, i32) {
    %c0_i32 = arith.constant 0 : i32
    %c0_i32_0 = arith.constant 0 : i32
    %c0_i32_1 = arith.constant 0 : i32
    return %arg0, %c0_i32, %c0_i32_0 : i32, i32, i32
  }
}

</mosaic_0001>

<bundles_post_ra>
// kernel: tpu_custom_call.1
= control target key start
LH: loop header
LB: loop body
LE: loop exit
PB: predicated region body
PF: predicated region fallthrough
CT: control target
= control target key end

     0   :  { %11 = vsyncpa [#allocation3], 0  ;;  %s529_s0 = inlined_call_operand.hbm [shape: f32[16,128], index: 0, kind: input, shape index: {}]   ;;  %s530_s1 = inlined_call_operand.hbm [shape: f32[16,128], index: 1, kind: input, shape index: {}]   ;;  %s531_s2 = inlined_call_operand.hbm [shape: f32[1,8,128], index: 2, kind: output, shape index: {0}]   ;;  %s532_s3 = inlined_call_operand.hbm [shape: f32[1,8,128], index: 3, kind: output, shape index: {1}]   ;;  %s533_s4 = inlined_call_operand.hbm [shape: f32[1,8,128], index: 4, kind: output, shape index: {2}]   ;;  %s534_s5 = inlined_call_operand.hbm [shape: f32[1,8,128], index: 5, kind: output, shape index: {3}]  }
   0x1   :  { %12 = vsyncpa [#allocation6], 0 }
   0x2   :  { %13 = vsyncpa [#allocation4], 0 }
   0x3   :  { %14 = vsyncpa [#allocation9], 0 }
   0x4   :  { %15 = vsyncpa [#allocation12], 0  ;;  %s384_s18 = smov [#allocation2]   ;;  %s242_s22 = scalar_lea.hbm %s529_s0, 256 }
   0x5   :  { %s27_s19 = sshll.u32 %s384_s18, 4  ;;  %p243_p0 = scmp.ne.s32.totalorder %s529_s0, %s242_s22  ;;  %s28_s19 = int_to_ptr.vmem [resolvable:$true] %s27_s19 }
   0x6   :  { %p246_p1 = scmp.lt.u32.totalorder %s242_s22, %s529_s0 }
   0x8   :  { %p248_p2 = pnand %p246_p1, %p243_p0 }
   0xa   :  { %251 = shalt.err (!%p248_p2)
}
   0xb   :  { %s252_s27 = scalar_lea.vmem %s28_s19, 256  ;;  %p257_p4 = scmp.lt.s32.totalorder %s28_s19, %s28_s19 }
   0xc   :  { %p253_p3 = scmp.ne.s32.totalorder %s28_s19, %s252_s27  ;;  %p258_p5 = scmp.lt.s32.totalorder %s252_s27, %s252_s27 }
   0xe   :  { %p259_p6 = por %p258_p5, %p257_p4 }
  0x10   :  { %p260_p7 = pnand %p259_p6, %p253_p3 }
  0x12   :  { %263 = shalt.err (!%p260_p7)
}
  0x13   :  { %s385_s28 = smov 128   ;;  %s386_s29 = smov 8  }
  0x14   :  { %33 = dma.hbm_to_vmem [thread:$0]  %s529_s0, 256, %s28_s19, [#allocation3], %s385_s28, %s385_s28, %s386_s29  }
  0x15   :  { %s387_s7 = smov [#allocation5]   ;;  %s264_s11 = scalar_lea.hbm %s530_s1, 256 }
  0x16   :  { %s45_s8 = sshll.u32 %s387_s7, 4  ;;  %p265_p8 = scmp.ne.s32.totalorder %s530_s1, %s264_s11  ;;  %s46_s8 = int_to_ptr.vmem [resolvable:$true] %s45_s8 }
  0x17   :  { %p268_p9 = scmp.lt.u32.totalorder %s264_s11, %s530_s1 }
  0x19   :  { %p270_p10 = pnand %p268_p9, %p265_p8 }
  0x1b   :  { %273 = shalt.err (!%p270_p10)
}
  0x1c   :  { %s274_s16 = scalar_lea.vmem %s46_s8, 256  ;;  %p279_p12 = scmp.lt.s32.totalorder %s46_s8, %s46_s8 }
  0x1d   :  { %p275_p11 = scmp.ne.s32.totalorder %s46_s8, %s274_s16  ;;  %p280_p13 = scmp.lt.s32.totalorder %s274_s16, %s274_s16 }
  0x1f   :  { %p281_p0 = por %p280_p13, %p279_p12 }
  0x21   :  { %p282_p1 = pnand %p281_p0, %p275_p11 }
  0x23   :  { %285 = shalt.err (!%p282_p1)
}
  0x24   :  { %51 = dma.hbm_to_vmem [thread:$0]  %s530_s1, 256, %s46_s8, [#allocation6], %s385_s28, %s385_s28, %s386_s29  }
  0x25   :  { %374 = dma.done.wait [#allocation3], 256  }
  0x26   :  { %375 = vsyncadd [#allocation3], 4294967040 }
  0x27   :  { %376 = dma.done.wait [#allocation6], 256  }
  0x28   :  { %377 = vsyncadd [#allocation6], 4294967040  ;;  %v79_v0 = vlaneseq  ;;  %v74_v7 = vld [vmem:[#allocation2] sm:$0xff]  ;;  %v75_v8 = vld [vmem:[#allocation2 + $0x8] sm:$0xff]  ;;  %s388_s1 = smov [#allocation11]   ;;  %s389_s19 = smov [#allocation8]  }
  0x29   :  { %v448_v9 = vld [vmem:[#allocation5] sm:$0xff]  ;;  %v215_v11 = vmul.f32 -1.442695, %v74_v7  ;;  %v216_v12 = vmul.f32 -1.442695, %v75_v8  ;;  %v458_v15 = vld [vmem:[#allocation5 + $0x8] sm:$0xff] }
  0x2a   :  { %v80_v1 = vshrl.u32 %v79_v0, 7  ;;  %v83_v2 = vand.u32 127, %v79_v0  ;;  %s190_s18 = sshll.u32 %s388_s1, 4  ;;  %s170_s20 = sshll.u32 %s389_s19, 4  ;;  %s191_s18 = int_to_ptr.vmem [resolvable:$true] %s190_s18  ;;  %s171_s20 = int_to_ptr.vmem [resolvable:$true] %s170_s20 }
  0x2b   :  { %226 = vpow2.f32 %v215_v11  ;;  %s390_s21 = smov [#allocation10]   ;;  %s286_s23 = scalar_lea.vmem %s191_s18, 128 }
  0x2c   :  { %v81_v3 = vadd.s32 8, %v80_v1  ;;  %v88_v4 = vmul.u32 128, %v80_v1  ;;  %228 = vpow2.f32 %v216_v12  ;;  %s180_s22 = sshll.u32 %s390_s21, 4  ;;  %p287_p2 = scmp.ne.s32.totalorder %s191_s18, %s286_s23  ;;  %s466_s22 = int_to_ptr.vmem [resolvable:$true] %s180_s22 }
  0x2d   :  { %p291_p3 = scmp.lt.s32.totalorder %s191_s18, %s191_s18  ;;  %p292_p4 = scmp.lt.s32.totalorder %s286_s23, %s286_s23 }
  0x2e   :  { %v89_v5 = vmul.u32 128, %v81_v3  ;;  %v446_v6 = vadd.s32 %v88_v4, %v83_v2 }
  0x2f   :  { %p293_p5 = por %p292_p4, %p291_p3 }
  0x30   :  { %v450_v10 = vadd.s32 %v89_v5, %v83_v2  ;;  %vm92_vm0 = vcmp.lt.s32.totalorder %v446_v6, 2048 }
  0x31   :  { %v130_v13 = vsel %vm92_vm0, %v74_v7, 0.0  ;;  %v132_v14 = vsel %vm92_vm0, %v448_v9, 0.0  ;;  %p294_p6 = pnand %p293_p5, %p287_p2 }
  0x32   :  { %vm93_vm1 = vcmp.lt.s32.totalorder %v450_v10, 2048  ;;  %v141_v16 = vmul.f32 %v132_v14, %v130_v13 }
  0x33   :  { %v131_v17 = vsel %vm93_vm1, %v75_v8, 0.0  ;;  %v133_v18 = vsel %vm93_vm1, %v458_v15, 0.0 }
  0x34   :  { %v142_v19 = vmul.f32 %v133_v18, %v131_v17  ;;  %v147_v20 = vadd.f32 %v131_v17, %v130_v13  ;;  %v151_v21 = vadd.f32 %v133_v18, %v132_v14 }
  0x36   :  { %v143_v22 = vadd.f32 %v142_v19, %v141_v16  ;;  %149 = vst [vmem:[#allocation10] sm:$0xff] %v147_v20  ;;  %153 = vst [vmem:[#allocation11] sm:$0xff] %v151_v21 }
  0x37   :  { %297 = shalt.err (!%p294_p6)
}
  0x38   :  { %s298_s26 = scalar_lea.hbm %s534_s5, 128 }
  0x39   :  { %p299_p7 = scmp.ne.s32.totalorder %s534_s5, %s298_s26  ;;  %p302_p8 = scmp.lt.u32.totalorder %s298_s26, %s534_s5 }
  0x3b   :  { %p304_p9 = pnand %p302_p8, %p299_p7 }
  0x3d   :  { %307 = shalt.err (!%p304_p9)
}
  0x3e   :  { %193 = dma.vmem_to_hbm [thread:$0]  %s191_s18, 128, %s534_s5, [#allocation12]   ;;  %145 = vst [vmem:[#allocation8] sm:$0xff] %v143_v22 }
  0x3f   :  { %s308_s8 = scalar_lea.vmem %s171_s20, 128  ;;  %p313_p11 = scmp.lt.s32.totalorder %s171_s20, %s171_s20 }
  0x40   :  { %p309_p10 = scmp.ne.s32.totalorder %s171_s20, %s308_s8  ;;  %p314_p12 = scmp.lt.s32.totalorder %s308_s8, %s308_s8 }
  0x42   :  { %p315_p13 = por %p314_p12, %p313_p11 }
  0x44   :  { %p316_p0 = pnand %p315_p13, %p309_p10 }
  0x46   :  { %319 = shalt.err (!%p316_p0)
}
  0x47   :  { %s320_s11 = scalar_lea.hbm %s532_s3, 128 }
  0x48   :  { %p321_p1 = scmp.ne.s32.totalorder %s532_s3, %s320_s11  ;;  %p324_p2 = scmp.lt.u32.totalorder %s320_s11, %s532_s3 }
  0x4a   :  { %p326_p3 = pnand %p324_p2, %p321_p1 }
  0x4c   :  { %329 = shalt.err (!%p326_p3)
}
  0x4d   :  { %173 = dma.vmem_to_hbm [thread:$0]  %s171_s20, 128, %s532_s3, [#allocation9]   ;;  %v227_v23 = vpop.eup %226 }
  0x4e   :  { %s330_s0 = scalar_lea.vmem %s466_s22, 128  ;;  %p335_p5 = scmp.lt.s32.totalorder %s466_s22, %s466_s22 }
  0x4f   :  { %p331_p4 = scmp.ne.s32.totalorder %s466_s22, %s330_s0  ;;  %p336_p6 = scmp.lt.s32.totalorder %s330_s0, %s330_s0 }
  0x51   :  { %p337_p7 = por %p336_p6, %p335_p5 }
  0x53   :  { %p338_p8 = pnand %p337_p7, %p331_p4 }
  0x55   :  { %341 = shalt.err (!%p338_p8)
}
  0x56   :  { %s342_s18 = scalar_lea.hbm %s533_s4, 128 }
  0x57   :  { %p343_p9 = scmp.ne.s32.totalorder %s533_s4, %s342_s18  ;;  %p346_p10 = scmp.lt.u32.totalorder %s342_s18, %s533_s4 }
  0x59   :  { %p348_p11 = pnand %p346_p10, %p343_p9 }
  0x5b   :  { %351 = shalt.err (!%p348_p11)
}
  0x5c   :  { %183 = dma.vmem_to_hbm [thread:$0]  %s466_s22, 128, %s533_s4, [#allocation9]   ;;  %v229_v24 = vpop.eup %228  ;;  %v100_v25 = vadd.f32 1.0, %v227_v23  ;;  %v122_v39 = vsub.f32 1.0, %v448_v9  ;;  %v123_v42 = vsub.f32 1.0, %v458_v15 }
  0x5d   :  { %v101_v26 = vadd.f32 1.0, %v229_v24  ;;  %s391_s4 = smov [#allocation7]  }
  0x5e   :  { %230 = vrcp.f32 %v100_v25  ;;  %s160_s22 = sshll.u32 %s391_s4, 4  ;;  %s161_s22 = int_to_ptr.vmem [resolvable:$true] %s160_s22 }
  0x5f   :  { %232 = vrcp.f32 %v101_v26  ;;  %s352_s25 = scalar_lea.vmem %s161_s22, 128  ;;  %p357_p13 = scmp.lt.s32.totalorder %s161_s22, %s161_s22 }
  0x60   :  { %p353_p12 = scmp.ne.s32.totalorder %s161_s22, %s352_s25  ;;  %p358_p0 = scmp.lt.s32.totalorder %s352_s25, %s352_s25 }
  0x62   :  { %p359_p1 = por %p358_p0, %p357_p13 }
  0x64   :  { %p360_p2 = pnand %p359_p1, %p353_p12 }
  0x68   :  { %v231_v27 = vpop.eup %230 }
  0x69   :  { %v233_v28 = vpop.eup %232  ;;  %234 = vlog2.f32 %v231_v27  ;;  %v112_v29 = vsub.f32 1.0, %v231_v27 }
  0x6a   :  { %236 = vlog2.f32 %v233_v28  ;;  %v113_v30 = vsub.f32 1.0, %v233_v28 }
  0x6b   :  { %238 = vlog2.f32 %v112_v29 }
  0x6c   :  { %240 = vlog2.f32 %v113_v30 }
  0x73   :  { %v235_v31 = vpop.eup %234 }
  0x74   :  { %v237_v32 = vpop.eup %236  ;;  %v107_v33 = vmul.f32 0.6931472, %v235_v31 }
  0x75   :  { %v239_v34 = vpop.eup %238  ;;  %v109_v35 = vmul.f32 0.6931472, %v237_v32 }
  0x76   :  { %v241_v36 = vpop.eup %240  ;;  %v110_v37 = vmax.f32 %v107_v33, -100.0  ;;  %v115_v38 = vmul.f32 0.6931472, %v239_v34 }
  0x77   :  { %v111_v40 = vmax.f32 %v109_v35, -100.0  ;;  %v117_v41 = vmul.f32 0.6931472, %v241_v36 }
  0x78   :  { %v118_v43 = vmax.f32 %v115_v38, -100.0  ;;  %v120_v44 = vmul.f32 %v110_v37, %v448_v9 }
  0x79   :  { %v119_v45 = vmax.f32 %v117_v41, -100.0  ;;  %v121_v46 = vmul.f32 %v111_v40, %v458_v15 }
  0x7a   :  { %v124_v47 = vmul.f32 %v122_v39, %v118_v43 }
  0x7b   :  { %v125_v48 = vmul.f32 %v123_v42, %v119_v45 }
  0x7c   :  { %v126_v49 = vadd.f32 %v124_v47, %v120_v44 }
  0x7d   :  { %v127_v50 = vadd.f32 %v125_v48, %v121_v46 }
  0x7e   :  { %v128_v51 = vsub.f32 0.0, %v126_v49 }
  0x7f   :  { %v129_v52 = vsub.f32 0.0, %v127_v50 }
  0x80   :  { %v134_v53 = vsel %vm92_vm0, %v128_v51, 0.0 }
  0x81   :  { %v135_v54 = vsel %vm93_vm1, %v129_v52, 0.0 }
  0x82   :  { %v137_v55 = vadd.f32 %v135_v54, %v134_v53 }
  0x84   :  { %139 = vst [vmem:[#allocation7] sm:$0xff] %v137_v55 }
  0x85   :  { %363 = shalt.err (!%p360_p2)
}
  0x86   :  { %s364_s28 = scalar_lea.hbm %s531_s2, 128 }
  0x87   :  { %p365_p3 = scmp.ne.s32.totalorder %s531_s2, %s364_s28  ;;  %p368_p4 = scmp.lt.u32.totalorder %s364_s28, %s531_s2 }
  0x89   :  { %p370_p5 = pnand %p368_p4, %p365_p3 }
  0x8b   :  { %373 = shalt.err (!%p370_p5)
}
  0x8c   :  { %163 = dma.vmem_to_hbm [thread:$0]  %s161_s22, 128, %s531_s2, [#allocation4]  }
  0x8d   :  { %378 = dma.done.wait [#allocation4], 128  }
  0x8e   :  { %379 = vsyncadd [#allocation4], 4294967168 }
  0x8f   :  { %380 = dma.done.wait [#allocation9], 256  }
  0x90   :  { %381 = vsyncadd [#allocation9], 4294967040 }
  0x91   :  { %382 = dma.done.wait [#allocation12], 128  }
  0x92   :  { %383 = vsyncadd [#allocation12], 4294967168 }
  0x93   :  { %206 = vsyncpa [#allocation3], 1 }
  0x94   :  { %207 = vsyncpa [#allocation6], 1 }
  0x95   :  { %208 = vsyncpa [#allocation4], 1 }
  0x96   :  { %209 = vsyncpa [#allocation9], 1 }
  0x97   :  { %210 = vsyncpa [#allocation12], 1 }

</bundles_post_ra>
